<compile_context>
chip_gen: v5e
topology: v5e:2x2
jax: 0.10.0
libtpu: 0.0.40
codegen_flags: <defaults>
</compile_context>

<pallas_src>
import functools

import numpy as np
import jax
import jax.numpy as jnp
from jax.experimental import pallas as pl
from jax.experimental.pallas import tpu as pltpu


def _round_up(x, m):
    return ((x + m - 1) // m) * m


def _vmem_limit_bytes():
    # Adaptive VMEM budget: ~75% of physical, capped at 96 MiB (v5e/v6e have
    # 128 MiB, v7x only 64 MiB).  Falls back to a v7x-safe value.
    try:
        phys = int(pltpu.get_tpu_info().vmem_capacity_bytes)
    except Exception:
        phys = 64 * 1024 * 1024
    return min(int(phys * 0.75), 96 * 1024 * 1024)


# TODO(synk): dynamic triplet mining (triplet_selector.get_triplets) has a
# data-dependent output shape; implemented on host as a deterministic
# batch-all selector (the original PyTorch selectors also run on CPU).  Mining
# selectors (hard / semi-hard) would change which triplets the mean runs over.
def batch_all_triplets(labels_np):
    labels_np = np.asarray(labels_np)
    n = len(labels_np)
    trips = []
    for a in range(n):
        for p in range(n):
            if p == a or labels_np[p] != labels_np[a]:
                continue
            for neg in range(n):
                if labels_np[neg] == labels_np[a]:
                    continue
                trips.append((a, p, neg))
    return np.asarray(trips, dtype=np.int32).reshape(-1, 3)


# ---------------- Kernel A: Gram matrix on the MXU ----------------------------
def _gram_kernel(ei_ref, ej_ref, out_ref, acc_ref):
    k = pl.program_id(2)

    @pl.when(k == 0)
    def _():
        acc_ref[...] = jnp.zeros_like(acc_ref)

    # (tm, tk) contract (tm, tk) over the feature dim -> (tm, tm), f32 acc.
    acc_ref[...] += jax.lax.dot_general(
        ei_ref[...], ej_ref[...],
        dimension_numbers=(((1,), (1,)), ((), ())),
        preferred_element_type=jnp.float32)

    @pl.when(k == pl.num_programs(2) - 1)
    def _():
        out_ref[...] = acc_ref[...]


# ---------------- Kernel B: hinge + masked-by-sentinel sum --------------------
def _hinge_sum_kernel(diff_ref, out_ref, acc_ref, *, margin, sub_tiles):
    step = pl.program_id(0)

    @pl.when(step == 0)
    def _():
        acc_ref[...] = jnp.zeros_like(acc_ref)

    # Padding rows were filled with -(margin + 1), so they hinge to exactly 0:
    # no iota/compare/select mask needed.
    hinge = jnp.maximum(diff_ref[...] + margin, 0.0)
    # Fold (tile_rows, 128) -> (8, 128) using VPU vreg adds only; the expensive
    # cross-lane/sublane reduction is deferred to the epilogue below.
    acc_ref[...] += jnp.sum(hinge.reshape(sub_tiles, 8, 128), axis=0)

    @pl.when(step == pl.num_programs(0) - 1)
    def _():
        partial = jnp.sum(acc_ref[...], axis=1, keepdims=True)   # (8, 1)
        out_ref[...] = jnp.sum(partial, axis=0, keepdims=True)   # (1, 1)


def online_triplet_loss(embeddings, triplets, margin, *, matmul_dtype=None):
    """Returns (mean hinge loss, number of triplets) — same as the torch module.

    matmul_dtype: optionally cast embeddings (e.g. to jnp.bfloat16) before the
    HBM-bound Gram kernel (~2x on Kernel A); the accumulation and all hinge
    math stay in f32.  Default None keeps the input dtype for exact-ish parity
    with the f32 reference.
    """
    num_triplets = int(triplets.shape[0])
    if num_triplets == 0:
        # Torch's losses.mean() over an empty tensor is NaN; guard the /0 here.
        return jnp.float32(jnp.nan), 0

    n_emb, d = embeddings.shape
    vmem_limit = _vmem_limit_bytes()

    # ---- Kernel A: Gram matrix ------------------------------------------------
    e = embeddings if matmul_dtype is None else embeddings.astype(matmul_dtype)

    tm = min(512, _round_up(n_emb, 8))
    tk = min(2048, _round_up(d, 128))
    n_pad = _round_up(n_emb, tm)
    d_pad = _round_up(d, tk)
    # Worst-case double-buffered working set (f32, tm=512, tk=2048):
    # 2*2*4 MiB inputs + 2*1 MiB out + 1 MiB acc ~= 19 MiB — fits every chip.
    e_pad = jnp.pad(e, ((0, n_pad - n_emb), (0, d_pad - d)))

    gram = pl.pallas_call(
        _gram_kernel,
        out_shape=jax.ShapeDtypeStruct((n_pad, n_pad), jnp.float32),
        grid_spec=pltpu.PrefetchScalarGridSpec(
            num_scalar_prefetch=0,
            grid=(n_pad // tm, n_pad // tm, d_pad // tk),
            in_specs=[pl.BlockSpec((tm, tk), lambda i, j, k: (i, k)),
                      pl.BlockSpec((tm, tk), lambda i, j, k: (j, k))],
            out_specs=pl.BlockSpec((tm, tm), lambda i, j, k: (i, j)),
            scratch_shapes=[pltpu.VMEM((tm, tm), jnp.float32)],
        ),
        compiler_params=pltpu.CompilerParams(
            dimension_semantics=("parallel", "parallel", "arbitrary"),
            vmem_limit_bytes=vmem_limit),
    )(e_pad, e_pad)

    # ---- Glue: single per-triplet diff stream (f32) ---------------------------
    a = triplets[:, 0].astype(jnp.int32)
    p = triplets[:, 1].astype(jnp.int32)
    n = triplets[:, 2].astype(jnp.int32)

    e32 = embeddings.astype(jnp.float32)
    sq_norms = jnp.sum(e32 * e32, axis=1)                 # (N,), f32

    gram_flat = gram.reshape(-1)                          # 1-D linearized takes
    g_ap = jnp.take(gram_flat, a * n_pad + p)
    g_an = jnp.take(gram_flat, a * n_pad + n)

    diff = (jnp.take(sq_norms, p) - 2.0 * g_ap) - (jnp.take(sq_norms, n) - 2.0 * g_an)
    diff = diff.astype(jnp.float32)

    # ---- Kernel B: hinge + sum over the lane-dense diff stream ----------------
    rows = _round_up(pl.cdiv(num_triplets, 128), 8)
    tile_rows = min(4096, rows)            # up to 512K triplets / grid step
    rows_pad = _round_up(rows, tile_rows)
    t_pad = rows_pad * 128

    sentinel = -(float(margin) + 1.0)      # hinges to exactly zero
    diff_pad = jnp.pad(diff, (0, t_pad - num_triplets),
                       constant_values=sentinel).reshape(rows_pad, 128)

    kernel = functools.partial(_hinge_sum_kernel, margin=float(margin),
                               sub_tiles=tile_rows // 8)

    total = pl.pallas_call(
        kernel,
        out_shape=jax.ShapeDtypeStruct((1, 1), jnp.float32),
        grid_spec=pltpu.PrefetchScalarGridSpec(
            num_scalar_prefetch=0,
            grid=(rows_pad // tile_rows,),
            in_specs=[pl.BlockSpec((tile_rows, 128), lambda i: (i, 0))],
            out_specs=pl.BlockSpec((1, 1), lambda i: (0, 0)),
            scratch_shapes=[pltpu.VMEM((8, 128), jnp.float32)],
        ),
        compiler_params=pltpu.CompilerParams(
            dimension_semantics=("arbitrary",),
            vmem_limit_bytes=vmem_limit),
    )(diff_pad)

    mean_loss = total[0, 0] / num_triplets
    return mean_loss, num_triplets


if __name__ == "__main__":
    margin = 1.0
    N, D = 8, 128   # small batch; D a multiple of 128 keeps the lane axis dense

    key = jax.random.PRNGKey(0)
    embeddings = jax.random.normal(key, (N, D), dtype=jnp.float32)
    labels = np.array([0, 0, 1, 1, 0, 1, 0, 1], dtype=np.int32)

    triplets = jnp.asarray(batch_all_triplets(labels))   # [T, 3], T = 96

    loss, n_triplets = online_triplet_loss(embeddings, triplets, margin)
    loss = jax.block_until_ready(loss)

    # Pure-JAX reference of the hot path (direct per-triplet distances).
    a = embeddings[triplets[:, 0]]
    p = embeddings[triplets[:, 1]]
    n = embeddings[triplets[:, 2]]
    ref = jnp.mean(jnp.maximum(
        jnp.sum((a - p) ** 2, axis=1) - jnp.sum((a - n) ** 2, axis=1) + margin,
        0.0))
    assert np.allclose(np.asarray(loss), np.asarray(ref), rtol=1e-4, atol=1e-3), (
        float(loss), float(ref))
    assert n_triplets == int(triplets.shape[0])

    print("KERNEL_OK")
</pallas_src>

<mosaic_0001>
module attributes {stable_mosaic.version = 11 : i64} {
  func.func @_gram_kernel(%arg0: i32, %arg1: i32, %arg2: i32, %arg3: memref<8x128xf32, #tpu.memory_space<vmem>>, %arg4: memref<8x128xf32, #tpu.memory_space<vmem>>, %arg5: memref<8x8xf32, #tpu.memory_space<vmem>>, %arg6: memref<8x8xf32, #tpu.memory_space<vmem>>) attributes {dimension_semantics = [#tpu.dimension_semantics<parallel>, #tpu.dimension_semantics<parallel>, #tpu.dimension_semantics<arbitrary>], iteration_bounds = array<i64: 1, 1, 1>, scalar_prefetch = 0 : i64, scratch_operands = 1 : i64, tpu.core_type = #tpu.core_type<tc>, window_params = [{transform_indices = @transform_0, window_bounds = array<i64: 8, 128>}, {transform_indices = @transform_1, window_bounds = array<i64: 8, 128>}, {transform_indices = @transform_2, window_bounds = array<i64: 8, 8>}]} {
    %c0_i32 = arith.constant 0 : i32
    %0 = arith.cmpi eq, %arg2, %c0_i32 : i32
    %1 = arith.extui %0 : i1 to i32
    %c0_i32_0 = arith.constant 0 : i32
    %2 = arith.cmpi ne, %1, %c0_i32_0 : i32
    scf.if %2 {
      %cst_10 = arith.constant 0.000000e+00 : f32
      %12 = vector.broadcast %cst_10 : f32 to vector<8x8xf32>
      %c0_11 = arith.constant 0 : index
      %c0_12 = arith.constant 0 : index
      %13 = vector.load %arg6[%c0_11, %c0_12] : memref<8x8xf32, #tpu.memory_space<vmem>>, vector<8x8xf32>
      tpu.vector_store %arg6[%c0_11, %c0_12], %12 {strides = array<i32>} : memref<8x8xf32, #tpu.memory_space<vmem>>, vector<8x8xf32>,
    } else {
    }
    %c0 = arith.constant 0 : index
    %c0_1 = arith.constant 0 : index
    %3 = vector.load %arg6[%c0, %c0_1] : memref<8x8xf32, #tpu.memory_space<vmem>>, vector<8x8xf32>
    %c0_2 = arith.constant 0 : index
    %c0_3 = arith.constant 0 : index
    %4 = vector.load %arg3[%c0_2, %c0_3] : memref<8x128xf32, #tpu.memory_space<vmem>>, vector<8x128xf32>
    %c0_4 = arith.constant 0 : index
    %c0_5 = arith.constant 0 : index
    %5 = vector.load %arg4[%c0_4, %c0_5] : memref<8x128xf32, #tpu.memory_space<vmem>>, vector<8x128xf32>
    %cst = arith.constant dense<0.000000e+00> : vector<8x8xf32>
    %6 = tpu.matmul %4, %5, %cst {dimension_numbers = #tpu.dot_dimension_numbers<[1], [1], [0], [0], [0, 0, 1, 0], [], []>} : vector<8x128xf32>, vector<8x128xf32>, vector<8x8xf32> -> vector<8x8xf32>
    %7 = arith.addf %3, %6 : vector<8x8xf32>
    %c0_6 = arith.constant 0 : index
    %c0_7 = arith.constant 0 : index
    %8 = vector.load %arg6[%c0_6, %c0_7] : memref<8x8xf32, #tpu.memory_space<vmem>>, vector<8x8xf32>
    tpu.vector_store %arg6[%c0_6, %c0_7], %7 {strides = array<i32>} : memref<8x8xf32, #tpu.memory_space<vmem>>, vector<8x8xf32>,
    %c0_i32_8 = arith.constant 0 : i32
    %9 = arith.cmpi eq, %arg2, %c0_i32_8 : i32
    %10 = arith.extui %9 : i1 to i32
    %c0_i32_9 = arith.constant 0 : i32
    %11 = arith.cmpi ne, %10, %c0_i32_9 : i32
    scf.if %11 {
      %c0_10 = arith.constant 0 : index
      %c0_11 = arith.constant 0 : index
      %12 = vector.load %arg6[%c0_10, %c0_11] : memref<8x8xf32, #tpu.memory_space<vmem>>, vector<8x8xf32>
      %c0_12 = arith.constant 0 : index
      %c0_13 = arith.constant 0 : index
      %13 = vector.load %arg5[%c0_12, %c0_13] : memref<8x8xf32, #tpu.memory_space<vmem>>, vector<8x8xf32>
      tpu.vector_store %arg5[%c0_12, %c0_13], %12 {strides = array<i32>} : memref<8x8xf32, #tpu.memory_space<vmem>>, vector<8x8xf32>,
    } else {
    }
    return
  }
  func.func @transform_0(%arg0: i32, %arg1: i32, %arg2: i32) -> (i32, i32) {
    %c0_i32 = arith.constant 0 : i32
    return %arg0, %arg2 : i32, i32
  }
  func.func @transform_1(%arg0: i32, %arg1: i32, %arg2: i32) -> (i32, i32) {
    %c0_i32 = arith.constant 0 : i32
    return %arg1, %arg2 : i32, i32
  }
  func.func @transform_2(%arg0: i32, %arg1: i32, %arg2: i32) -> (i32, i32) {
    %c0_i32 = arith.constant 0 : i32
    return %arg0, %arg1 : i32, i32
  }
}

</mosaic_0001>

<bundles_post_ra>
// kernel: tpu_custom_call.1
= control target key start
LH: loop header
LB: loop body
LE: loop exit
PB: predicated region body
PF: predicated region fallthrough
CT: control target
= control target key end

     0   :  { %7 = vsyncpa [#allocation4], 0  ;;  %s208_s0 = inlined_call_operand.hbm [shape: f32[8,128], index: 0, kind: input, shape index: {}]   ;;  %s209_s1 = inlined_call_operand.hbm [shape: f32[8,128], index: 1, kind: input, shape index: {}]   ;;  %s210_s2 = inlined_call_operand.hbm [shape: f32[8,8], index: 2, kind: output, shape index: {}]  }
   0x1   :  { %8 = vsyncpa [#allocation7], 0 }
   0x2   :  { %9 = vsyncpa [#allocation5], 0  ;;  %s15_s11 = sshll.u32 %s208_s0, 4  ;;  %s177_s12 = smov [#allocation3]   ;;  %s16_s11 = int_to_ptr.hbm [resolvable:$true] %s15_s11 }
   0x3   :  { %s17_s13 = sshll.u32 %s177_s12, 4  ;;  %s26_s16 = sshll.u32 %s209_s1, 4  ;;  %s18_s13 = int_to_ptr.vmem [resolvable:$true] %s17_s13  ;;  %s27_s16 = int_to_ptr.hbm [resolvable:$true] %s26_s16 }
   0x4   :  { %20 = dma.hbm_to_vmem [thread:$0]  %s16_s11, 128, %s18_s13, [#allocation4]  }
   0x5   :  { %s178_s17 = smov [#allocation6]  }
   0x6   :  { %s28_s18 = sshll.u32 %s178_s17, 4  ;;  %s29_s18 = int_to_ptr.vmem [resolvable:$true] %s28_s18 }
   0x7   :  { %31 = dma.hbm_to_vmem [thread:$0]  %s27_s16, 128, %s29_s18, [#allocation7]  }
   0x8   :  { %171 = dma.done.wait [#allocation4], 128  }
   0x9   :  { %172 = vsyncadd [#allocation4], 4294967168 }
   0xa   :  { %173 = dma.done.wait [#allocation7], 128  }
   0xb   :  { %174 = vsyncadd [#allocation7], 4294967168  ;;  %vm44_vm0 = vcmask 64512   ;;  %v179_v0 = vmov 0.0   ;;  %v48_v1 = vld [vmem:[#allocation6] sm:$0xff]  ;;  %v47_v2 = vld [vmem:[#allocation3] sm:$0xff] }
   0xc   :  { %45 = vst.msk [vmem:[#allocation2] sm:$0xff] %vm44_vm0, %v179_v0  ;;  %64 = vmatpush.xpose.msra.mxu0 %v48_v1  ;;  %s180_s0 = smov [#allocation8]   ;;  %s84_s21 = sshll.u32 %s210_s2, 4  ;;  %s85_s21 = int_to_ptr.hbm [resolvable:$true] %s84_s21 }
   0xd   :  { %s82_s1 = sshll.u32 %s180_s0, 4  ;;  %s83_s1 = int_to_ptr.vmem [resolvable:$true] %s82_s1 }
   0xf   :  { %65 = vmatmul.f32.vlgmr.msra.gmra.mxu0 %v47_v2 }
  0x13   :  { %v46_v3 = vld [vmem:[#allocation2] sm:$0xff] }
  0x8c   :  { %v66_v4 = vpop.f32.mrf.mxu0 }
  0x8d   :  { %v69_v5 = vadd.f32 %v66_v4, %v46_v3 }
  0x8f   :  { %71 = vst.msk [vmem:[#allocation2] sm:$0xff] %vm44_vm0, %v69_v5 }
  0x96   :  { %v75_v6 = vld [vmem:[#allocation2] sm:$0xff] }
  0x97   :  { %76 = vst.msk [vmem:[#allocation8] sm:$0xff] %vm44_vm0, %v75_v6 }
  0x98   :  { %87 = dma.vmem_to_hbm [thread:$0]  %s83_s1, 128, %s85_s21, [#allocation5]  }
  0x99   :  { %175 = dma.done.wait [#allocation5], 128  }
  0x9a   :  { %176 = vsyncadd [#allocation5], 4294967168 }
  0x9b   :  { %92 = vsyncpa [#allocation4], 1 }
  0x9c   :  { %93 = vsyncpa [#allocation7], 1 }
  0x9d   :  { %94 = vsyncpa [#allocation5], 1 }

</bundles_post_ra>
